<compile_context>
chip_gen: v6e
topology: v6e:2x2x1
jax: 0.10.0
libtpu: 0.0.40
codegen_flags: <defaults>
</compile_context>

<pallas_src>
import math

import jax
import jax.numpy as jnp
from jax.experimental import pallas as pl
from jax.experimental.pallas import tpu as pltpu


def _round_up(x, m):
    return ((x + m - 1) // m) * m


def _cdiv(a, b):
    return (a + b - 1) // b


def _make_resident_spec_factory():
    """Constant-index, VMEM-resident operand spec.  Single-buffered when the
    installed jax supports pipeline_mode=pl.Buffered(1); otherwise fall back to
    the default (double-buffered) spec and account for it in the VMEM budget."""
    try:
        pl.BlockSpec((8, 128), lambda i: (0, 0), pipeline_mode=pl.Buffered(1))

        def factory(shape):
            return pl.BlockSpec(shape, lambda i: (0, 0), pipeline_mode=pl.Buffered(1))

        return factory, 1
    except Exception:  # pragma: no cover - older jax without pipeline_mode
        def factory(shape):
            return pl.BlockSpec(shape, lambda i: (0, 0))

        return factory, 2


_RESIDENT_SPEC, _RESIDENT_BUFFERS = _make_resident_spec_factory()


def _mlp_graph_kernel(x_ref, w1_ref, b1_ref, w2_ref, b2_ref, o_ref):
    # NetworkInput node: identity.  Cast per-tile to the matmul dtype (no-op in
    # the pure-f32 path; avoids a whole extra HBM pass over x in the wrapper).
    x = x_ref[...].astype(w1_ref.dtype)

    # FullyConnected #1 (dropout disabled): MXU dot with f32 accumulate,
    # bias + ReLU epilogue in f32 on the VPU.
    h = jnp.dot(x, w1_ref[...], preferred_element_type=jnp.float32)
    h = jnp.maximum(h + b1_ref[...], 0.0)

    # FullyConnected #2: cast the hidden back to the matmul dtype (no-op in f32
    # mode), f32 accumulate, bias + Tanh epilogue in f32 (EUP).
    y = jnp.dot(h.astype(w2_ref.dtype), w2_ref[...],
                preferred_element_type=jnp.float32)
    y = jnp.tanh(y + b2_ref[...])

    # NetworkOutput node: activation=None -> identity; lane-dense (128-padded)
    # store in the requested output dtype.
    o_ref[...] = y.astype(o_ref.dtype)


def make_neural_network_forward(w1, b1, w2, b2, *,
                                use_bf16=True,
                                block_rows=512,
                                out_dtype=jnp.float32,
                                vmem_limit_bytes=48 * 1024 * 1024):
    """Build fused forward  tanh( relu(x @ w1.T + b1) @ w2.T + b2 )  (nn.Linear layout).

    Parameter pad/transpose/cast happens ONCE here; the returned jitted callable
    only moves activations per call.

    w1: (H, D_in)   b1: (H,) or (1, H)
    w2: (D_out, H)  b2: (D_out,) or (1, D_out)

    use_bf16=True feeds the MXU its native bf16 operands (f32 accumulate); this
    changes numerics vs. torch.nn.Linear f32 — use_bf16=False for near-exact f32.
    v6e note: with generous VMEM (128 MiB physical) block_rows can be swept up to
    1024-2048; the default 512 is chosen to also fit v5e/v7x scoped budgets.
    """
    d_hid, d_in = w1.shape
    d_out = w2.shape[0]

    mm_dtype = jnp.bfloat16 if use_bf16 else jnp.float32
    mm_bytes = 2 if use_bf16 else 4
    out_bytes = jnp.dtype(out_dtype).itemsize

    d_in_p = _round_up(d_in, 128)
    d_hid_p = _round_up(d_hid, 128)
    d_out_p = _round_up(d_out, 128)

    # ---- one-time parameter layout plumbing (pad + transpose + cast) --------
    # TODO(synk): optional fp8 weight path (v7x MXU) with per-channel scales in
    # the f32 epilogue for very large weight matrices.
    w1_t = jnp.zeros((d_in_p, d_hid_p), mm_dtype).at[:d_in, :d_hid].set(
        w1.T.astype(mm_dtype))
    w2_t = jnp.zeros((d_hid_p, d_out_p), mm_dtype).at[:d_hid, :d_out].set(
        w2.T.astype(mm_dtype))
    b1_p = jnp.zeros((1, d_hid_p), jnp.float32).at[:, :d_hid].set(
        jnp.reshape(b1, (1, -1)).astype(jnp.float32))
    b2_p = jnp.zeros((1, d_out_p), jnp.float32).at[:, :d_out].set(
        jnp.reshape(b2, (1, -1)).astype(jnp.float32))

    # ---- VMEM budget ---------------------------------------------------------
    # Resident weights/biases (x buffer count) must fit alongside the pipelined
    # activation tiles AND the (tm, d_hid_p) f32 hidden intermediate (+ its bf16
    # copy feeding the second dot) — the hidden intermediate dominates for large
    # hidden sizes, not the x/out tiles.
    weights_vmem = _RESIDENT_BUFFERS * (
        (d_in_p * d_hid_p + d_hid_p * d_out_p) * mm_bytes
        + (d_hid_p + d_out_p) * 4)
    budget = int(vmem_limit_bytes * 0.8)  # headroom for compiler scratch/spill
    if weights_vmem > budget:
        # TODO(synk): add a grid axis over d_in / d_hid (K-tiling) with an f32
        # accumulator for hidden sizes whose weights cannot stay VMEM-resident.
        raise NotImplementedError(
            f"resident weights need {weights_vmem} B > VMEM budget {budget} B")

    row_bytes = (2 * d_in_p * 4                      # double-buffered x tile (worst case f32)
                 + 2 * d_out_p * out_bytes           # double-buffered out tile
                 + d_hid_p * 4                       # f32 hidden intermediate
                 + (d_hid_p * mm_bytes if mm_dtype != jnp.float32 else 0))
    tm_cap = max(8, ((budget - weights_vmem) // row_bytes) // 8 * 8)
    tm_target = max(8, min(_round_up(block_rows, 8), tm_cap))

    min_rows_per_step = 256  # keep the 256-wide v6e/v7x MXU pipeline full

    def fwd(x):
        n = x.shape[0]
        assert x.shape[1] == d_in, (x.shape, d_in)
        n_8 = _round_up(n, 8)

        # Row-grid sizing: pad only to a multiple of 8 per step (no up-to-tm
        # waste); give v7x's two TensorCores >= 2 steps whenever each step can
        # still carry >= min_rows_per_step rows.
        steps_cap = max(1, n_8 // 8)
        num_steps = _cdiv(n_8, tm_target)
        if num_steps < 2 and n_8 >= 2 * min_rows_per_step:
            num_steps = 2
        num_steps = max(1, min(num_steps, steps_cap))
        tm = _round_up(_cdiv(n_8, num_steps), 8)
        n_p = tm * num_steps

        # Activations: skip the pad copy entirely when already aligned;
        # otherwise fuse pad + cast into one pass.
        if n_p == n and d_in_p == d_in:
            x_p = x
        else:
            x_p = jnp.zeros((n_p, d_in_p), mm_dtype).at[:n, :d_in].set(
                x.astype(mm_dtype))

        out_p = pl.pallas_call(
            _mlp_graph_kernel,
            out_shape=jax.ShapeDtypeStruct((n_p, d_out_p), out_dtype),
            grid=(num_steps,),
            in_specs=[
                pl.BlockSpec((tm, d_in_p), lambda i: (i, 0)),  # row-tiled activations
                _RESIDENT_SPEC((d_in_p, d_hid_p)),             # VMEM-resident,
                _RESIDENT_SPEC((1, d_hid_p)),                  # single-buffered
                _RESIDENT_SPEC((d_hid_p, d_out_p)),            # weights / biases
                _RESIDENT_SPEC((1, d_out_p)),
            ],
            out_specs=pl.BlockSpec((tm, d_out_p), lambda i: (i, 0)),
            compiler_params=pltpu.CompilerParams(
                dimension_semantics=("parallel",),   # batch axis -> both v7x TCs
                vmem_limit_bytes=vmem_limit_bytes,   # raise v5e/v6e/v7x scoped defaults
            ),
        )(x_p, w1_t, b1_p, w2_t, b2_p)

        if n_p == n and d_out_p == d_out:
            return out_p
        return out_p[:n, :d_out]

    return jax.jit(fwd)


def neural_network_forward(x, w1, b1, w2, b2, **kwargs):
    """One-shot convenience wrapper.  For repeated inference, call
    make_neural_network_forward once and reuse the returned callable so the
    weight pad/transpose/cast is not redone every forward."""
    return make_neural_network_forward(w1, b1, w2, b2, **kwargs)(x)


def _reference_forward(x, w1, b1, w2, b2):
    h = jnp.maximum(x @ w1.T + jnp.reshape(b1, (1, -1)), 0.0)
    return jnp.tanh(h @ w2.T + jnp.reshape(b2, (1, -1)))


if __name__ == "__main__":
    # Small, module-consistent shapes: batch=8, d_in=32, d_hidden=64, d_out=16.
    N, D_IN, D_HID, D_OUT = 8, 32, 64, 16

    key = jax.random.PRNGKey(0)
    kx, k1, k2, k3, k4 = jax.random.split(key, 5)

    x = jax.random.normal(kx, (N, D_IN), dtype=jnp.float32)
    # nn.Linear-shaped synthetic parameters: weights are (out_features, in_features).
    w1 = jax.random.normal(k1, (D_HID, D_IN), dtype=jnp.float32) * (1.0 / math.sqrt(D_IN))
    b1 = jax.random.normal(k2, (1, D_HID), dtype=jnp.float32) * 0.01
    w2 = jax.random.normal(k3, (D_OUT, D_HID), dtype=jnp.float32) * (1.0 / math.sqrt(D_HID))
    b2 = jax.random.normal(k4, (1, D_OUT), dtype=jnp.float32) * 0.01

    ref = _reference_forward(x, w1, b1, w2, b2)

    # Default path: bf16 MXU operands, f32 accumulate (looser tolerance by design).
    fwd_bf16 = make_neural_network_forward(w1, b1, w2, b2)          # use_bf16=True
    out = jax.block_until_ready(fwd_bf16(x))
    assert out.shape == (N, D_OUT), out.shape
    assert jnp.allclose(out, ref, atol=5e-2, rtol=5e-2), "bf16 path mismatch vs reference"

    # Exact-ish f32 path (tolerance covers TPU matmul precision modes).
    fwd_f32 = make_neural_network_forward(w1, b1, w2, b2, use_bf16=False)
    out_f32 = jax.block_until_ready(fwd_f32(x))
    assert jnp.allclose(out_f32, ref, atol=1e-2, rtol=1e-2), "f32 path mismatch vs reference"

    print("KERNEL_OK")
</pallas_src>

<mosaic_0001>
module attributes {stable_mosaic.version = 11 : i64} {
  func.func @_mlp_graph_kernel(%arg0: i32, %arg1: memref<8x128xbf16, #tpu.memory_space<vmem>>, %arg2: memref<128x128xbf16, #tpu.memory_space<vmem>>, %arg3: memref<1x128xf32, #tpu.memory_space<vmem>>, %arg4: memref<128x128xbf16, #tpu.memory_space<vmem>>, %arg5: memref<1x128xf32, #tpu.memory_space<vmem>>, %arg6: memref<8x128xf32, #tpu.memory_space<vmem>>) attributes {dimension_semantics = [#tpu.dimension_semantics<parallel>], iteration_bounds = array<i64: 1>, scalar_prefetch = 0 : i64, scratch_operands = 0 : i64, tpu.core_type = #tpu.core_type<tc>, window_params = [{transform_indices = @transform_0, window_bounds = array<i64: 8, 128>}, {pipeline_mode = #tpu.pipeline_mode<synchronous>, transform_indices = @transform_1, window_bounds = array<i64: 128, 128>}, {pipeline_mode = #tpu.pipeline_mode<synchronous>, transform_indices = @transform_2, window_bounds = array<i64: 1, 128>}, {pipeline_mode = #tpu.pipeline_mode<synchronous>, transform_indices = @transform_3, window_bounds = array<i64: 128, 128>}, {pipeline_mode = #tpu.pipeline_mode<synchronous>, transform_indices = @transform_4, window_bounds = array<i64: 1, 128>}, {transform_indices = @transform_5, window_bounds = array<i64: 8, 128>}]} {
    %c0 = arith.constant 0 : index
    %c0_0 = arith.constant 0 : index
    %0 = vector.load %arg1[%c0, %c0_0] : memref<8x128xbf16, #tpu.memory_space<vmem>>, vector<8x128xbf16>
    %c0_1 = arith.constant 0 : index
    %c0_2 = arith.constant 0 : index
    %1 = vector.load %arg2[%c0_1, %c0_2] : memref<128x128xbf16, #tpu.memory_space<vmem>>, vector<128x128xbf16>
    %cst = arith.constant dense<0.000000e+00> : vector<8x128xf32>
    %2 = tpu.matmul %0, %1, %cst {dimension_numbers = #tpu.dot_dimension_numbers<[1], [0], [0], [1], [0, 0, 1, 1], [], []>} : vector<8x128xbf16>, vector<128x128xbf16>, vector<8x128xf32> -> vector<8x128xf32>
    %c0_3 = arith.constant 0 : index
    %c0_4 = arith.constant 0 : index
    %3 = vector.load %arg3[%c0_3, %c0_4] : memref<1x128xf32, #tpu.memory_space<vmem>>, vector<1x128xf32>
    %4 = vector.broadcast %3 : vector<1x128xf32> to vector<8x128xf32>
    %5 = arith.addf %2, %4 : vector<8x128xf32>
    %cst_5 = arith.constant 0.000000e+00 : f32
    %6 = vector.broadcast %cst_5 : f32 to vector<8x128xf32>
    %7 = arith.maximumf %5, %6 : vector<8x128xf32>
    %8 = arith.truncf %7 : vector<8x128xf32> to vector<8x128xbf16>
    %c0_6 = arith.constant 0 : index
    %c0_7 = arith.constant 0 : index
    %9 = vector.load %arg4[%c0_6, %c0_7] : memref<128x128xbf16, #tpu.memory_space<vmem>>, vector<128x128xbf16>
    %cst_8 = arith.constant dense<0.000000e+00> : vector<8x128xf32>
    %10 = tpu.matmul %8, %9, %cst_8 {dimension_numbers = #tpu.dot_dimension_numbers<[1], [0], [0], [1], [0, 0, 1, 1], [], []>} : vector<8x128xbf16>, vector<128x128xbf16>, vector<8x128xf32> -> vector<8x128xf32>
    %c0_9 = arith.constant 0 : index
    %c0_10 = arith.constant 0 : index
    %11 = vector.load %arg5[%c0_9, %c0_10] : memref<1x128xf32, #tpu.memory_space<vmem>>, vector<1x128xf32>
    %12 = vector.broadcast %11 : vector<1x128xf32> to vector<8x128xf32>
    %13 = arith.addf %10, %12 : vector<8x128xf32>
    %14 = math.tanh %13 : vector<8x128xf32>
    %c0_11 = arith.constant 0 : index
    %c0_12 = arith.constant 0 : index
    %15 = vector.load %arg6[%c0_11, %c0_12] : memref<8x128xf32, #tpu.memory_space<vmem>>, vector<8x128xf32>
    tpu.vector_store %arg6[%c0_11, %c0_12], %14 {strides = array<i32>} : memref<8x128xf32, #tpu.memory_space<vmem>>, vector<8x128xf32>,
    return
  }
  func.func @transform_0(%arg0: i32) -> (i32, i32) {
    %c0_i32 = arith.constant 0 : i32
    %c0_i32_0 = arith.constant 0 : i32
    return %arg0, %c0_i32 : i32, i32
  }
  func.func @transform_1(%arg0: i32) -> (i32, i32) {
    %c0_i32 = arith.constant 0 : i32
    %c0_i32_0 = arith.constant 0 : i32
    %c0_i32_1 = arith.constant 0 : i32
    return %c0_i32, %c0_i32_0 : i32, i32
  }
  func.func @transform_2(%arg0: i32) -> (i32, i32) {
    %c0_i32 = arith.constant 0 : i32
    %c0_i32_0 = arith.constant 0 : i32
    %c0_i32_1 = arith.constant 0 : i32
    return %c0_i32, %c0_i32_0 : i32, i32
  }
  func.func @transform_3(%arg0: i32) -> (i32, i32) {
    %c0_i32 = arith.constant 0 : i32
    %c0_i32_0 = arith.constant 0 : i32
    %c0_i32_1 = arith.constant 0 : i32
    return %c0_i32, %c0_i32_0 : i32, i32
  }
  func.func @transform_4(%arg0: i32) -> (i32, i32) {
    %c0_i32 = arith.constant 0 : i32
    %c0_i32_0 = arith.constant 0 : i32
    %c0_i32_1 = arith.constant 0 : i32
    return %c0_i32, %c0_i32_0 : i32, i32
  }
  func.func @transform_5(%arg0: i32) -> (i32, i32) {
    %c0_i32 = arith.constant 0 : i32
    %c0_i32_0 = arith.constant 0 : i32
    return %arg0, %c0_i32 : i32, i32
  }
}

</mosaic_0001>

<bundles_post_ra>
// kernel: fwd.1
= control target key start
LH: loop header
LB: loop body
LE: loop exit
PB: predicated region body
PF: predicated region fallthrough
CT: control target
= control target key end

     0   :  { %10 = vsyncpa [#allocation3], 0  ;;  %s515_s0 = inlined_call_operand.vmem [shape: bf16[8,128], index: 0, kind: input, shape index: {}]   ;;  %s516_s1 = inlined_call_operand.hbm [shape: bf16[128,128], index: 1, kind: input, shape index: {}]   ;;  %s517_s2 = inlined_call_operand.vmem [shape: f32[1,128], index: 2, kind: input, shape index: {}]   ;;  %s518_s3 = inlined_call_operand.hbm [shape: bf16[128,128], index: 3, kind: input, shape index: {}]   ;;  %s519_s4 = inlined_call_operand.vmem [shape: f32[1,128], index: 4, kind: input, shape index: {}]   ;;  %s520_s5 = inlined_call_operand.hbm [shape: f32[8,128], index: 5, kind: output, shape index: {}]  }
   0x1   :  { %11 = vsyncpa [#allocation6], 0 }
   0x2   :  { %12 = vsyncpa [#allocation4], 0  ;;  %s460_s18 = smov [#allocation2]  }
   0x3   :  { %s20_s19 = sshll.u32 %s460_s18, 4  ;;  %s21_s19 = int_to_ptr.vmem [resolvable:$true] %s20_s19 }
   0x4   :  { %s402_s20 = scalar_lea.vmem %s21_s19, 1024  ;;  %p407_p1 = scmp.lt.s32.totalorder %s21_s19, %s21_s19 }
   0x5   :  { %p403_p0 = scmp.ne.s32.totalorder %s21_s19, %s402_s20  ;;  %p408_p2 = scmp.lt.s32.totalorder %s402_s20, %s402_s20 }
   0x7   :  { %p409_p3 = por %p408_p2, %p407_p1 }
   0x9   :  { %p410_p4 = pnand %p409_p3, %p403_p0 }
   0xb   :  { %413 = shalt.err (!%p410_p4)
}
   0xc   :  { %s461_s21 = smov 64   ;;  %s462_s22 = smov 4  }
   0xd   :  { %26 = dma.hbm_to_vmem [thread:$0]  %s516_s1, 1024, %s21_s19, [#allocation3], %s461_s21, %s461_s21, %s462_s22  }
   0xe   :  { %s463_s25 = smov [#allocation5]  }
   0xf   :  { %s34_s26 = sshll.u32 %s463_s25, 4  ;;  %s35_s26 = int_to_ptr.vmem [resolvable:$true] %s34_s26 }
  0x10   :  { %s422_s27 = scalar_lea.vmem %s35_s26, 1024  ;;  %p427_p6 = scmp.lt.s32.totalorder %s35_s26, %s35_s26 }
  0x11   :  { %p423_p5 = scmp.ne.s32.totalorder %s35_s26, %s422_s27  ;;  %p428_p7 = scmp.lt.s32.totalorder %s422_s27, %s422_s27 }
  0x13   :  { %p429_p8 = por %p428_p7, %p427_p6 }
  0x15   :  { %p430_p9 = pnand %p429_p8, %p423_p5 }
  0x17   :  { %433 = shalt.err (!%p430_p9)
}
  0x18   :  { %40 = dma.hbm_to_vmem [thread:$0]  %s518_s3, 1024, %s35_s26, [#allocation6], %s461_s21, %s461_s21, %s462_s22  }
  0x19   :  { %454 = dma.done.wait [#allocation3], 1024  }
  0x1a   :  { %455 = vsyncadd [#allocation3], 4294966272 }
  0x1b   :  { %456 = dma.done.wait [#allocation6], 1024  }
  0x1c   :  { %457 = vsyncadd [#allocation6], 4294966272  ;;  %v464_v0 = vmov 0.0   ;;  %vm465_vm0 = vmmov 0   ;;  %v376_v1 = vld [vmem:[#allocation2 + $0x38] sm:$0xff]   ;;  %v377_v2 = vld [vmem:[#allocation2 + $0x30] sm:$0xff]  }
  0x1d   :  { %329 = vmatprep.subr.bf16.mxu0 %v464_v0  ;;  %345 = vmatprep.mubr.msk.bf16.mxu0 %vm465_vm0, %v464_v0  ;;  %v378_v3 = vld [vmem:[#allocation2 + $0x28] sm:$0xff]   ;;  %v384_v4 = vld [vmem:[#allocation5 + $0x38] sm:$0xff]   ;;  %v379_v5 = vld [vmem:[#allocation2 + $0x20] sm:$0xff]   ;;  %s466_s8 = smov [#allocation7]  }
  0x1e   :  { %349 = vmatprep.subr.bf16.mxu1 %v464_v0  ;;  %365 = vmatprep.mubr.msk.bf16.mxu1 %vm465_vm0, %v464_v0  ;;  %v385_v6 = vld [vmem:[#allocation5 + $0x30] sm:$0xff]   ;;  %v380_v7 = vld [vmem:[#allocation2 + $0x18] sm:$0xff]   ;;  %v386_v8 = vld [vmem:[#allocation5 + $0x28] sm:$0xff]  }
  0x1f   :  { %330 = vmatpush3.bf16.msra.mxu0 %v376_v1  ;;  %350 = vmatpush3.bf16.msra.mxu1 %v384_v4  ;;  %v381_v9 = vld [vmem:[#allocation2 + $0x10] sm:$0xff]   ;;  %v387_v10 = vld [vmem:[#allocation5 + $0x20] sm:$0xff]   ;;  %v382_v11 = vld [vmem:[#allocation2 + $0x8] sm:$0xff]  }
  0x20   :  { %331 = vmatprep.subr.bf16.mxu0 %v464_v0  ;;  %351 = vmatprep.subr.bf16.mxu1 %v464_v0  ;;  %v388_v12 = vld [vmem:[#allocation5 + $0x18] sm:$0xff]   ;;  %v383_v13 = vld [vmem:[#allocation2] sm:$0xff]   ;;  %v389_v14 = vld [vmem:[#allocation5 + $0x10] sm:$0xff]  }
  0x21   :  { %v50_v15 = vld [vmem:[%s515_s0] sm:$0xf]  ;;  %v390_v16 = vld [vmem:[#allocation5 + $0x8] sm:$0xff]  }
  0x22   :  { %v391_v17 = vld [vmem:[#allocation5] sm:$0xff]  }
  0x23   :  { %332 = vmatpush3.bf16.msra.mxu0 %v377_v2  ;;  %352 = vmatpush3.bf16.msra.mxu1 %v385_v6  ;;  %v293_v18 = vld [vmem:[%s517_s2] ss:$0 sm:$0xff]  ;;  %s283_s2 = sshll.u32 %s466_s8, 4  ;;  %s284_s2 = int_to_ptr.vmem [resolvable:$true] %s283_s2 }
  0x24   :  { %333 = vmatprep.subr.bf16.mxu0 %v464_v0  ;;  %353 = vmatprep.subr.bf16.mxu1 %v464_v0  ;;  %v302_v26 = vld [vmem:[%s519_s4] ss:$0 sm:$0xff]  ;;  %s434_s9 = scalar_lea.vmem %s284_s2, 128  ;;  %p439_p11 = scmp.lt.s32.totalorder %s284_s2, %s284_s2 }
  0x25   :  { %p435_p10 = scmp.ne.s32.totalorder %s284_s2, %s434_s9  ;;  %p440_p12 = scmp.lt.s32.totalorder %s434_s9, %s434_s9 }
  0x27   :  { %334 = vmatpush3.bf16.msra.mxu0 %v378_v3  ;;  %354 = vmatpush3.bf16.msra.mxu1 %v386_v8  ;;  %p441_p13 = por %p440_p12, %p439_p11 }
  0x28   :  { %335 = vmatprep.subr.bf16.mxu0 %v464_v0  ;;  %355 = vmatprep.subr.bf16.mxu1 %v464_v0 }
  0x29   :  { %p442_p0 = pnand %p441_p13, %p435_p10 }
  0x2b   :  { %336 = vmatpush3.bf16.msra.mxu0 %v379_v5  ;;  %356 = vmatpush3.bf16.msra.mxu1 %v387_v10 }
  0x2c   :  { %337 = vmatprep.subr.bf16.mxu0 %v464_v0  ;;  %357 = vmatprep.subr.bf16.mxu1 %v464_v0 }
  0x2f   :  { %338 = vmatpush3.bf16.msra.mxu0 %v380_v7  ;;  %358 = vmatpush3.bf16.msra.mxu1 %v388_v12 }
  0x30   :  { %339 = vmatprep.subr.bf16.mxu0 %v464_v0  ;;  %359 = vmatprep.subr.bf16.mxu1 %v464_v0 }
  0x33   :  { %340 = vmatpush3.bf16.msra.mxu0 %v381_v9  ;;  %360 = vmatpush3.bf16.msra.mxu1 %v389_v14 }
  0x34   :  { %341 = vmatprep.subr.bf16.mxu0 %v464_v0  ;;  %361 = vmatprep.subr.bf16.mxu1 %v464_v0 }
  0x37   :  { %342 = vmatpush3.bf16.msra.mxu0 %v382_v11  ;;  %362 = vmatpush3.bf16.msra.mxu1 %v390_v16 }
  0x38   :  { %343 = vmatprep.subr.bf16.mxu0 %v464_v0  ;;  %363 = vmatprep.subr.bf16.mxu1 %v464_v0 }
  0x3b   :  { %344 = vmatpush3.bf16.msra.mxu0 %v383_v13  ;;  %364 = vmatpush3.bf16.msra.mxu1 %v391_v17 }
  0x3e   :  { %346 = vmatmul.mubr.bf16.vlgmr.msra.gmra.mxu0 %v50_v15 }
  0xfe   :  { %v156_v19 = vpop.f32.mrf.mxu0 }
  0xff   :  { %v157_v20 = vadd.f32 %v293_v18, %v156_v19 }
 0x100   :  { %v347_v21 = vpop.f32.mrf.mxu0 }
 0x101   :  { %v162_v22 = vmax.f32 %v157_v20, 0.0 }
 0x102   :  { %v159_v23 = vpop.f32.mrf.mxu0 }
 0x103   :  { %v163_v24 = vpack.c.bf16 %v162_v22, %v162_v22 }
 0x104   :  { %v348_v25 = vpop.f32.mrf.mxu0 }
 0x105   :  { %366 = vmatmul.mubr.bf16.vlgmr.msra.gmra.mxu1 %v163_v24 }
 0x1c5   :  { %v269_v27 = vpop.f32.mrf.mxu1 }
 0x1c6   :  { %v270_v28 = vadd.f32 %v302_v26, %v269_v27 }
 0x1c7   :  { %v367_v29 = vpop.f32.mrf.mxu1 }
 0x1c8   :  { %392 = vtanh.f32 %v270_v28 }
 0x1c9   :  { %v272_v30 = vpop.f32.mrf.mxu1 }
 0x1cb   :  { %v368_v31 = vpop.f32.mrf.mxu1 }
 0x1d5   :  { %v393_v32 = vpop.eup %392 }
 0x1d6   :  { %276 = vst [vmem:[#allocation7] sm:$0xff] %v393_v32 }
 0x1d7   :  { %445 = shalt.err (!%p442_p0)
}
 0x1d8   :  { %286 = dma.vmem_to_hbm [thread:$0]  %s284_s2, 128, %s520_s5, [#allocation4]  }
 0x1d9   :  { %458 = dma.done.wait [#allocation4], 128  }
 0x1da   :  { %459 = vsyncadd [#allocation4], 4294967168 }
 0x1db   :  { %290 = vsyncpa [#allocation3], 1 }
 0x1dc   :  { %291 = vsyncpa [#allocation6], 1 }
 0x1dd   :  { %292 = vsyncpa [#allocation4], 1 }

</bundles_post_ra>
